<compile_context>
chip_gen: v5e
topology: v5e:2x2
jax: 0.10.0
libtpu: 0.0.40
codegen_flags: <defaults>
</compile_context>

<pallas_src>
import functools

import jax
import jax.numpy as jnp
import numpy as np
from jax.experimental import pallas as pl
from jax.experimental.pallas import tpu as pltpu

_GOLDEN = np.uint32(0x9E3779B9)
_MIX1 = np.uint32(0x7FEB352D)
_MIX2 = np.uint32(0x846CA68B)


def _round_up(v, m):
    return (v + m - 1) // m * m


def _dropout_keep_mask(shape, seed_u32, row_off_u32, col_off_u32, d_ff, dropout_p):
    """Counter-based hash RNG: keep-mask for inverted dropout.

    The random stream depends only on (seed, global row, global d_ff column),
    so it is identical regardless of tile sizes / grid order.  Runs on the VPU
    (plain integer ops), so it also works in interpret mode.
    """
    rows = jax.lax.broadcasted_iota(jnp.int32, shape, 0).astype(jnp.uint32) + row_off_u32
    cols = jax.lax.broadcasted_iota(jnp.int32, shape, 1).astype(jnp.uint32) + col_off_u32
    x = rows * np.uint32(d_ff) + cols          # global element counter (mod 2^32)
    x = x + seed_u32 * _GOLDEN                 # mix in the seed
    x = x ^ (x >> 16)
    x = x * _MIX1
    x = x ^ (x >> 15)
    x = x * _MIX2
    x = x ^ (x >> 16)
    # Keep prob = 1 - p up to 2^-32 rounding of the threshold (negligible bias).
    thresh = np.uint32(min(int(float(dropout_p) * 4294967296.0), 4294967295))
    return x >= thresh


def _elementwise_phase(h, b1, seed_ref, row_off, col_off, d_ff, dropout_p):
    """bias + ReLU + (optional) inverted dropout, all in f32 on the VPU."""
    h = jnp.maximum(h + b1, 0.0)
    if dropout_p > 0.0:
        seed_u32 = seed_ref[0].astype(jnp.uint32)
        keep = _dropout_keep_mask(h.shape, seed_u32,
                                  row_off.astype(jnp.uint32),
                                  col_off.astype(jnp.uint32),
                                  d_ff, dropout_p)
        inv_keep = np.float32(1.0 / (1.0 - dropout_p))
        h = jnp.where(keep, h * inv_keep, 0.0)
    return h


def ffn_kernel_resident(seed_ref, x_ref, w1_ref, b1_ref, w2_ref, b2_ref, o_ref,
                        *, dropout_p, compute_dtype, tm, d_ff):
    # x_ref : (tm, d_model)      w1_ref: (d_model, d_ff)  b1_ref: (1, d_ff)
    # w2_ref: (d_ff, d_model)    b2_ref: (1, d_model)     o_ref : (tm, d_model)
    i = pl.program_id(0)
    x = x_ref[...].astype(compute_dtype)          # cast on load (no wrapper pass)
    h = jnp.dot(x, w1_ref[...], preferred_element_type=jnp.float32)
    h = _elementwise_phase(h, b1_ref[...], seed_ref,
                           row_off=i * tm, col_off=jnp.int32(0),
                           d_ff=d_ff, dropout_p=dropout_p)
    y = jnp.dot(h.astype(compute_dtype), w2_ref[...],
                preferred_element_type=jnp.float32)
    o_ref[...] = (y + b2_ref[...]).astype(o_ref.dtype)


def ffn_kernel_chunked(seed_ref, x_ref, w1_ref, b1_ref, w2_ref, b2_ref, o_ref,
                       acc_ref, *, dropout_p, compute_dtype, tm, tk, d_ff):
    # x_ref : (tm, d_model)      w1_ref: (d_model, tk)   b1_ref: (1, tk)
    # w2_ref: (tk, d_model)      b2_ref: (1, d_model)
    # o_ref : (tm, d_model)      acc_ref: (tm, d_model) f32 scratch
    i = pl.program_id(0)
    k = pl.program_id(1)
    nk = pl.num_programs(1)

    @pl.when(k == 0)
    def _():
        acc_ref[...] = jnp.zeros_like(acc_ref)

    x = x_ref[...].astype(compute_dtype)
    h = jnp.dot(x, w1_ref[...], preferred_element_type=jnp.float32)
    h = _elementwise_phase(h, b1_ref[...], seed_ref,
                           row_off=i * tm, col_off=k * tk,
                           d_ff=d_ff, dropout_p=dropout_p)
    acc_ref[...] += jnp.dot(h.astype(compute_dtype), w2_ref[...],
                            preferred_element_type=jnp.float32)

    @pl.when(k == nk - 1)
    def _():
        o_ref[...] = (acc_ref[...] + b2_ref[...]).astype(o_ref.dtype)


def _vmem_budget_bytes():
    """Chip VMEM capacity minus headroom (v5e/v6e 128 MiB, v7x 64 MiB)."""
    try:
        cap = int(pltpu.get_tpu_info().vmem_capacity_bytes)
    except Exception:
        cap = 64 << 20  # conservative fallback (covers v7x)
    return max(cap - (8 << 20), 32 << 20)


def feed_forward_block(x, w1, b1, w2, b2, *, dropout_p=0.0, seed=0,
                       tm=512, tk=1024, compute_dtype=jnp.bfloat16):
    """x: (batch, seq, d_model); w1: (d_model, d_ff); w2: (d_ff, d_model).

    Tile guidance:
      tm (row tile): ~512 on v5e, 512-1024 on v6e/v7x when N allows.  Weights are
        re-streamed per row tile only in the chunked fallback, so larger tm raises
        arithmetic intensity there.
      tk (d_ff tile, chunked fallback only): multiple of 128 (prefer 256) and a
        divisor of d_ff; 1024-2048 on v6e, ~512-1024 on v7x (64 MiB VMEM).
      MXU-friendly shapes: d_model / d_ff multiples of 256 on v6e/v7x, 128 on
        v5e; smaller d_model under-utilises the MXU contraction/output dims.
    compute_dtype: MXU operand dtype (bf16 default); accumulation is f32.
    """
    orig_dtype = x.dtype
    B, S, d_model = x.shape
    d_ff = w1.shape[1]
    assert w1.shape == (d_model, d_ff) and w2.shape == (d_ff, d_model)
    assert b1.shape == (d_ff,) and b2.shape == (d_model,)

    N = B * S
    tm = max(8, min(tm, _round_up(N, 8)))
    N_pad = _round_up(N, tm)

    xf = x.reshape(N, d_model)
    if N_pad != N:
        # Only the ragged last row tile costs an extra pad pass; padded rows
        # produce garbage that is sliced off below.
        xf = jnp.pad(xf, ((0, N_pad - N), (0, 0)))

    cbytes = jnp.dtype(compute_dtype).itemsize
    xbytes = jnp.dtype(orig_dtype).itemsize
    obytes = jnp.dtype(orig_dtype).itemsize

    w1c = w1.astype(compute_dtype)
    w2c = w2.astype(compute_dtype)
    b1r = b1.reshape(1, d_ff).astype(jnp.float32)
    b2r = b2.reshape(1, d_model).astype(jnp.float32)
    seed_arr = jnp.asarray([seed], dtype=jnp.int32)

    vmem_budget = _vmem_budget_bytes()
    n_rows = N_pad // tm

    # ---- resident-weights fast path estimate (conservative: 2x weight bufs) ----
    resident_est = (2 * 2 * d_model * d_ff * cbytes            # W1 + W2 buffers
                    + 2 * tm * d_model * (xbytes + obytes)     # x / out double-buffered
                    + 2 * 2 * (d_ff + d_model) * 4             # biases
                    + 2 * tm * d_ff * 4                        # h f32 + RNG bits temporaries
                    + tm * d_model * 4)                        # GEMM2 f32 result
    use_resident = resident_est + (4 << 20) <= vmem_budget

    flops = 4 * N_pad * d_model * d_ff  # two GEMMs, 2 flops / MAC

    if use_resident:
        vmem_limit = int(min(max(resident_est + (8 << 20), 32 << 20), vmem_budget))
        bytes_accessed = (N_pad * d_model * xbytes
                          + 2 * d_model * d_ff * cbytes        # weights read once
                          + (d_ff + d_model) * 4
                          + N_pad * d_model * obytes)
        out = pl.pallas_call(
            functools.partial(ffn_kernel_resident, dropout_p=float(dropout_p),
                              compute_dtype=compute_dtype, tm=tm, d_ff=d_ff),
            out_shape=jax.ShapeDtypeStruct((N_pad, d_model), orig_dtype),
            grid_spec=pltpu.PrefetchScalarGridSpec(
                num_scalar_prefetch=1,                     # dropout seed in SMEM
                grid=(n_rows,),
                in_specs=[
                    pl.BlockSpec((tm, d_model), lambda i, s: (i, 0)),      # x rows
                    pl.BlockSpec((d_model, d_ff), lambda i, s: (0, 0)),    # W1 resident
                    pl.BlockSpec((1, d_ff),       lambda i, s: (0, 0)),    # b1
                    pl.BlockSpec((d_ff, d_model), lambda i, s: (0, 0)),    # W2 resident
                    pl.BlockSpec((1, d_model),    lambda i, s: (0, 0)),    # b2
                ],
                out_specs=pl.BlockSpec((tm, d_model), lambda i, s: (i, 0)),
            ),
            compiler_params=pltpu.CompilerParams(
                dimension_semantics=("parallel",),
                vmem_limit_bytes=vmem_limit,
            ),
            cost_estimate=pl.CostEstimate(flops=flops, transcendentals=0,
                                          bytes_accessed=bytes_accessed),
        )(seed_arr, xf, w1c, b1r, w2c, b2r)
    else:
        # ---- chunked fallback: d_ff tiled, f32 accumulator over the k axis ----
        tk = min(tk, d_ff)
        if tk != d_ff and (d_ff % tk != 0 or tk % 128 != 0):
            cand = (tk // 128) * 128
            while cand >= 128 and d_ff % cand != 0:
                cand -= 128
            tk = cand if cand >= 128 else d_ff
        assert d_ff % tk == 0 and (tk == d_ff or tk % 128 == 0), \
            "d_ff tile tk must divide d_ff and be a multiple of 128"

        chunk_est = (2 * 2 * d_model * tk * cbytes             # W1/W2 chunks, dbl-buffered
                     + 2 * tm * d_model * (xbytes + obytes)    # x / out
                     + 2 * 2 * (tk + d_model) * 4              # biases
                     + 2 * tm * tk * 4                         # h f32 + RNG bits
                     + tm * d_model * 4                        # f32 accumulator scratch
                     + tm * d_model * 4)                       # GEMM2 partial result
        vmem_limit = int(min(max(chunk_est + (8 << 20), 32 << 20), vmem_budget))
        bytes_accessed = (N_pad * d_model * xbytes
                          + n_rows * 2 * d_model * d_ff * cbytes  # weights re-streamed
                          + (d_ff + d_model) * 4
                          + N_pad * d_model * obytes)
        out = pl.pallas_call(
            functools.partial(ffn_kernel_chunked, dropout_p=float(dropout_p),
                              compute_dtype=compute_dtype, tm=tm, tk=tk, d_ff=d_ff),
            out_shape=jax.ShapeDtypeStruct((N_pad, d_model), orig_dtype),
            grid_spec=pltpu.PrefetchScalarGridSpec(
                num_scalar_prefetch=1,
                grid=(n_rows, d_ff // tk),
                in_specs=[
                    pl.BlockSpec((tm, d_model), lambda i, k, s: (i, 0)),   # x rows
                    pl.BlockSpec((d_model, tk), lambda i, k, s: (0, k)),   # W1 chunk
                    pl.BlockSpec((1, tk),       lambda i, k, s: (0, k)),   # b1 chunk
                    pl.BlockSpec((tk, d_model), lambda i, k, s: (k, 0)),   # W2 chunk
                    pl.BlockSpec((1, d_model),  lambda i, k, s: (0, 0)),   # b2
                ],
                out_specs=pl.BlockSpec((tm, d_model), lambda i, k, s: (i, 0)),
                scratch_shapes=[pltpu.VMEM((tm, d_model), jnp.float32)],
            ),
            compiler_params=pltpu.CompilerParams(
                dimension_semantics=("parallel", "arbitrary"),
                vmem_limit_bytes=vmem_limit,
            ),
            cost_estimate=pl.CostEstimate(flops=flops, transcendentals=0,
                                          bytes_accessed=bytes_accessed),
        )(seed_arr, xf, w1c, b1r, w2c, b2r)

    if N_pad != N:
        out = out[:N]
    return out.reshape(B, S, d_model)


if __name__ == "__main__":
    # Small shapes consistent with the module: batch=2, seq=8, d_model=32, d_ff=64
    batch, seq, d_model, d_ff = 2, 8, 32, 64

    key = jax.random.PRNGKey(0)
    kx, kw1, kb1, kw2, kb2 = jax.random.split(key, 5)

    x = jax.random.normal(kx, (batch, seq, d_model), dtype=jnp.float32)

    # nn.Linear-style init: U(-1/sqrt(fan_in), 1/sqrt(fan_in)); weights (in, out).
    lim1 = 1.0 / (d_model ** 0.5)
    lim2 = 1.0 / (d_ff ** 0.5)
    w1 = jax.random.uniform(kw1, (d_model, d_ff), jnp.float32, -lim1, lim1)
    b1 = jax.random.uniform(kb1, (d_ff,), jnp.float32, -lim1, lim1)
    w2 = jax.random.uniform(kw2, (d_ff, d_model), jnp.float32, -lim2, lim2)
    b2 = jax.random.uniform(kb2, (d_model,), jnp.float32, -lim2, lim2)

    ref = jnp.maximum(x @ w1 + b1, 0.0) @ w2 + b2

    # 1) f32 MXU path: exact check against the pure-JAX reference (eval mode).
    out_f32 = feed_forward_block(x, w1, b1, w2, b2, dropout_p=0.0,
                                 compute_dtype=jnp.float32)
    out_f32 = jax.block_until_ready(out_f32)
    assert out_f32.shape == (batch, seq, d_model)
    assert jnp.allclose(out_f32, ref, atol=1e-5, rtol=1e-5), "f32 mismatch vs reference"

    # 2) Default fast path: bf16 MXU operands, f32 accumulate (looser tolerance).
    out_bf16 = feed_forward_block(x, w1, b1, w2, b2, dropout_p=0.0)
    out_bf16 = jax.block_until_ready(out_bf16)
    assert jnp.allclose(out_bf16, ref, atol=5e-2, rtol=5e-2), "bf16 mismatch vs reference"

    # 3) Training-mode dropout: shape/finiteness + determinism for a fixed seed.
    #    (Mask is a counter-based hash of (seed, element index) — NOT torch's RNG.)
    out_drop = feed_forward_block(x, w1, b1, w2, b2, dropout_p=0.1, seed=123,
                                  compute_dtype=jnp.float32)
    out_drop = jax.block_until_ready(out_drop)
    assert out_drop.shape == (batch, seq, d_model)
    assert bool(jnp.all(jnp.isfinite(out_drop)))
    out_drop2 = jax.block_until_ready(
        feed_forward_block(x, w1, b1, w2, b2, dropout_p=0.1, seed=123,
                           compute_dtype=jnp.float32))
    assert jnp.allclose(out_drop, out_drop2), "dropout not deterministic for fixed seed"

    print("KERNEL_OK")
</pallas_src>

<mosaic_0001>
module attributes {stable_mosaic.version = 11 : i64} {
  func.func @ffn_kernel_resident(%arg0: i32, %arg1: memref<1xi32, #tpu.memory_space<smem>>, %arg2: memref<16x32xf32, #tpu.memory_space<vmem>>, %arg3: memref<32x64xf32, #tpu.memory_space<vmem>>, %arg4: memref<1x64xf32, #tpu.memory_space<vmem>>, %arg5: memref<64x32xf32, #tpu.memory_space<vmem>>, %arg6: memref<1x32xf32, #tpu.memory_space<vmem>>, %arg7: memref<16x32xf32, #tpu.memory_space<vmem>>) attributes {dimension_semantics = [#tpu.dimension_semantics<parallel>], iteration_bounds = array<i64: 1>, scalar_prefetch = 1 : i64, scratch_operands = 0 : i64, tpu.core_type = #tpu.core_type<tc>, window_params = [{transform_indices = @transform_0, window_bounds = array<i64: 16, 32>}, {pipeline_mode = #tpu.pipeline_mode<synchronous>, transform_indices = @transform_1, window_bounds = array<i64: 32, 64>}, {pipeline_mode = #tpu.pipeline_mode<synchronous>, transform_indices = @transform_2, window_bounds = array<i64: 1, 64>}, {pipeline_mode = #tpu.pipeline_mode<synchronous>, transform_indices = @transform_3, window_bounds = array<i64: 64, 32>}, {pipeline_mode = #tpu.pipeline_mode<synchronous>, transform_indices = @transform_4, window_bounds = array<i64: 1, 32>}, {transform_indices = @transform_5, window_bounds = array<i64: 16, 32>}]} {
    %c0 = arith.constant 0 : index
    %c0_0 = arith.constant 0 : index
    %0 = vector.load %arg2[%c0, %c0_0] : memref<16x32xf32, #tpu.memory_space<vmem>>, vector<16x32xf32>
    %c0_1 = arith.constant 0 : index
    %c0_2 = arith.constant 0 : index
    %1 = vector.load %arg3[%c0_1, %c0_2] : memref<32x64xf32, #tpu.memory_space<vmem>>, vector<32x64xf32>
    %cst = arith.constant dense<0.000000e+00> : vector<16x64xf32>
    %2 = tpu.matmul %0, %1, %cst {dimension_numbers = #tpu.dot_dimension_numbers<[1], [0], [0], [1], [0, 0, 1, 1], [], []>} : vector<16x32xf32>, vector<32x64xf32>, vector<16x64xf32> -> vector<16x64xf32>
    %c0_3 = arith.constant 0 : index
    %c0_4 = arith.constant 0 : index
    %3 = vector.load %arg4[%c0_3, %c0_4] : memref<1x64xf32, #tpu.memory_space<vmem>>, vector<1x64xf32>
    %4 = vector.broadcast %3 : vector<1x64xf32> to vector<16x64xf32>
    %5 = arith.addf %2, %4 : vector<16x64xf32>
    %cst_5 = arith.constant 0.000000e+00 : f32
    %6 = vector.broadcast %cst_5 : f32 to vector<16x64xf32>
    %7 = arith.maximumf %5, %6 : vector<16x64xf32>
    %c0_6 = arith.constant 0 : index
    %c0_7 = arith.constant 0 : index
    %8 = vector.load %arg5[%c0_6, %c0_7] : memref<64x32xf32, #tpu.memory_space<vmem>>, vector<64x32xf32>
    %cst_8 = arith.constant dense<0.000000e+00> : vector<16x32xf32>
    %9 = tpu.matmul %7, %8, %cst_8 {dimension_numbers = #tpu.dot_dimension_numbers<[1], [0], [0], [1], [0, 0, 1, 1], [], []>} : vector<16x64xf32>, vector<64x32xf32>, vector<16x32xf32> -> vector<16x32xf32>
    %c0_9 = arith.constant 0 : index
    %c0_10 = arith.constant 0 : index
    %10 = vector.load %arg6[%c0_9, %c0_10] : memref<1x32xf32, #tpu.memory_space<vmem>>, vector<1x32xf32>
    %11 = vector.broadcast %10 : vector<1x32xf32> to vector<16x32xf32>
    %12 = arith.addf %9, %11 : vector<16x32xf32>
    %c0_11 = arith.constant 0 : index
    %c0_12 = arith.constant 0 : index
    %13 = vector.load %arg7[%c0_11, %c0_12] : memref<16x32xf32, #tpu.memory_space<vmem>>, vector<16x32xf32>
    tpu.vector_store %arg7[%c0_11, %c0_12], %12 {strides = array<i32>} : memref<16x32xf32, #tpu.memory_space<vmem>>, vector<16x32xf32>,
    return
  }
  func.func @transform_0(%arg0: i32, %arg1: memref<1xi32, #tpu.memory_space<smem>>) -> (i32, i32) {
    %c0_i32 = arith.constant 0 : i32
    %c0_i32_0 = arith.constant 0 : i32
    return %arg0, %c0_i32 : i32, i32
  }
  func.func @transform_1(%arg0: i32, %arg1: memref<1xi32, #tpu.memory_space<smem>>) -> (i32, i32) {
    %c0_i32 = arith.constant 0 : i32
    %c0_i32_0 = arith.constant 0 : i32
    %c0_i32_1 = arith.constant 0 : i32
    return %c0_i32, %c0_i32_0 : i32, i32
  }
  func.func @transform_2(%arg0: i32, %arg1: memref<1xi32, #tpu.memory_space<smem>>) -> (i32, i32) {
    %c0_i32 = arith.constant 0 : i32
    %c0_i32_0 = arith.constant 0 : i32
    %c0_i32_1 = arith.constant 0 : i32
    return %c0_i32, %c0_i32_0 : i32, i32
  }
  func.func @transform_3(%arg0: i32, %arg1: memref<1xi32, #tpu.memory_space<smem>>) -> (i32, i32) {
    %c0_i32 = arith.constant 0 : i32
    %c0_i32_0 = arith.constant 0 : i32
    %c0_i32_1 = arith.constant 0 : i32
    return %c0_i32, %c0_i32_0 : i32, i32
  }
  func.func @transform_4(%arg0: i32, %arg1: memref<1xi32, #tpu.memory_space<smem>>) -> (i32, i32) {
    %c0_i32 = arith.constant 0 : i32
    %c0_i32_0 = arith.constant 0 : i32
    %c0_i32_1 = arith.constant 0 : i32
    return %c0_i32, %c0_i32_0 : i32, i32
  }
  func.func @transform_5(%arg0: i32, %arg1: memref<1xi32, #tpu.memory_space<smem>>) -> (i32, i32) {
    %c0_i32 = arith.constant 0 : i32
    %c0_i32_0 = arith.constant 0 : i32
    return %arg0, %c0_i32 : i32, i32
  }
}

</mosaic_0001>

<bundles_post_ra>
// kernel: tpu_custom_call.1
= control target key start
LH: loop header
LB: loop body
LE: loop exit
PB: predicated region body
PF: predicated region fallthrough
CT: control target
= control target key end

     0   :  { %s267_s0 = inlined_call_operand.<no memory space> [shape: s32[1], index: 0, kind: input, shape index: {}]   ;;  %s268_s1 = inlined_call_operand.vmem [shape: f32[16,32], index: 1, kind: input, shape index: {}]   ;;  %s269_s2 = inlined_call_operand.vmem [shape: f32[32,64], index: 2, kind: input, shape index: {}]   ;;  %s270_s3 = inlined_call_operand.vmem [shape: f32[1,64], index: 3, kind: input, shape index: {}]   ;;  %s271_s4 = inlined_call_operand.vmem [shape: f32[64,32], index: 4, kind: input, shape index: {}]   ;;  %s272_s5 = inlined_call_operand.vmem [shape: f32[1,32], index: 5, kind: input, shape index: {}]   ;;  %s273_s6 = inlined_call_operand.hbm [shape: f32[16,32], index: 6, kind: output, shape index: {}]  }
   0x1   :  { %v28_v0 = vld [vmem:[%s269_s2 + $0x18] sm:$0xff]  ;;  %v27_v1 = vld [vmem:[%s269_s2 + $0x10] sm:$0xff]  ;;  %v26_v2 = vld [vmem:[%s269_s2 + $0x8] sm:$0xff] }
   0x2   :  { %131 = vmatpush.msra.mxu3 %v28_v0  ;;  %52 = vmatpush.msra.mxu0 %v28_v0  ;;  %v72_v3 = vld [vmem:[%s271_s4 + $0x38] sm:$0xff]  ;;  %v71_v4 = vld [vmem:[%s271_s4 + $0x30] sm:$0xff]  ;;  %v25_v5 = vld [vmem:[%s269_s2] sm:$0xff] }
   0x3   :  { %135 = vmatpush.msra.mxu2 %v72_v3  ;;  %92 = vmatpush.msra.mxu1 %v72_v3 }
   0x4   :  { %132 = vmatpush.msra.mxu3 %v27_v1  ;;  %53 = vmatpush.msra.mxu0 %v27_v1 }
   0x5   :  { %12 = vsyncpa [#allocation5], 0  ;;  %v24_v6 = vld [vmem:[%s268_s1 + $0x8] sm:$0xff]  ;;  %vm33_vm0 = vcmask 261120   ;;  %v23_v7 = vld [vmem:[%s268_s1] sm:$0xff]  ;;  %136 = vmatpush.msra.mxu2 %v71_v4  ;;  %93 = vmatpush.msra.mxu1 %v71_v4  ;;  %vm77_vm1 = vcmask 523264  }
   0x6   :  { %133 = vmatpush.msra.mxu3 %v26_v2  ;;  %54 = vmatpush.msra.mxu0 %v26_v2  ;;  %v70_v8 = vld [vmem:[%s271_s4 + $0x28] sm:$0xff]  ;;  %v69_v9 = vld [vmem:[%s271_s4 + $0x20] sm:$0xff]  ;;  %v68_v10 = vld [vmem:[%s271_s4 + $0x18] sm:$0xff]  ;;  %s115_s27 = sshll.u32 %s273_s6, 4  ;;  %s175_s28 = smov 128   ;;  %s116_s27 = int_to_ptr.hbm [resolvable:$true] %s115_s27 }
   0x7   :  { %137 = vmatpush.msra.mxu2 %v70_v8  ;;  %94 = vmatpush.msra.mxu1 %v70_v8  ;;  %v67_v11 = vld [vmem:[%s271_s4 + $0x10] sm:$0xff]  ;;  %v66_v12 = vld [vmem:[%s271_s4 + $0x8] sm:$0xff]  ;;  %v65_v13 = vld [vmem:[%s271_s4] sm:$0xff]  ;;  %s174_s4 = smov [#allocation4]   ;;  %s176_s29 = smov 8  }
   0x8   :  { %134 = vmatpush.msra.mxu3 %v25_v5  ;;  %55 = vmatpush.msra.mxu0 %v25_v5  ;;  %v146_v14 = vld [vmem:[%s270_s3] ss:$0 sm:$0xff]  ;;  %s113_s25 = sshll.u32 %s174_s4, 4  ;;  %s114_s25 = int_to_ptr.vmem [resolvable:$true] %s113_s25 }
   0x9   :  { %128 = vmatmul.msk.f32.vlgmr.msra.gmra.mxu3 %vm33_vm0, %v24_v6  ;;  %127 = vmatmul.msk.f32.vlgmr.msra.gmra.mxu0 %vm33_vm0, %v23_v7  ;;  %v147_v21 = vld [vmem:[%s272_s5] ss:$0 sm:$0xff] }
   0xa   :  { %138 = vmatpush.msra.mxu2 %v69_v9  ;;  %95 = vmatpush.msra.mxu1 %v69_v9 }
   0xc   :  { %139 = vmatpush.msra.mxu2 %v68_v10  ;;  %96 = vmatpush.msra.mxu1 %v68_v10 }
   0xe   :  { %140 = vmatpush.msra.mxu2 %v67_v11  ;;  %97 = vmatpush.msra.mxu1 %v67_v11 }
  0x10   :  { %141 = vmatpush.msra.mxu2 %v66_v12  ;;  %98 = vmatpush.msra.mxu1 %v66_v12 }
  0x12   :  { %142 = vmatpush.msra.mxu2 %v65_v13  ;;  %99 = vmatpush.msra.mxu1 %v65_v13 }
  0x86   :  { %v57_v15 = vpop.f32.mrf.mxu0 }
  0x87   :  { %v58_v16 = vadd.f32 %v146_v14, %v57_v15 }
  0x89   :  { %v63_v17 = vmax.f32 %v58_v16, 0.0 }
  0x8b   :  { %129 = vmatmul.msk.f32.vlgmr.msra.gmra.mxu1 %vm77_vm1, %v63_v17 }
  0x8c   :  { %v60_v18 = vpop.f32.mrf.mxu3 }
  0x8d   :  { %v61_v19 = vadd.f32 %v146_v14, %v60_v18 }
  0x8f   :  { %v64_v20 = vmax.f32 %v61_v19, 0.0 }
  0x91   :  { %130 = vmatmul.msk.f32.vlgmr.msra.gmra.mxu2 %vm77_vm1, %v64_v20 }
 0x108   :  { %v101_v22 = vpop.f32.mrf.mxu1 }
 0x109   :  { %v102_v23 = vadd.f32 %v147_v21, %v101_v22 }
 0x10b   :  { %107 = vst.msk [vmem:[#allocation4] sm:$0xff] %vm33_vm0, %v102_v23 }
 0x114   :  { %v104_v24 = vpop.f32.mrf.mxu2 }
 0x115   :  { %v105_v25 = vadd.f32 %v147_v21, %v104_v24 }
 0x117   :  { %108 = vst.msk [vmem:[#allocation4 + $0x8] sm:$0xff] %vm33_vm0, %v105_v25 }
 0x118   :  { %121 = dma.vmem_to_hbm [thread:$0]  %s114_s25, 256, %s116_s27, [#allocation5], %s175_s28, %s175_s28, %s176_s29  }
 0x119   :  { %172 = dma.done.wait [#allocation5], 256  }
 0x11a   :  { %173 = vsyncadd [#allocation5], 4294967040 }
 0x11b   :  { %126 = vsyncpa [#allocation5], 1 }

</bundles_post_ra>
